<compile_context>
chip_gen: v7x
topology: tpu7x:2x2x1
jax: 0.10.0
libtpu: 0.0.40
codegen_flags: <defaults>
</compile_context>

<pallas_src>
import functools

import jax
import jax.numpy as jnp
from jax.experimental import pallas as pl
from jax.experimental.pallas import tpu as pltpu


# ----------------------------------------------------------------------------
# helpers
# ----------------------------------------------------------------------------
def _pick_tile(dim, unit, cap):
    """Largest divisor of `dim` that is a multiple of `unit` and <= cap.

    Falls back to the full dim if it is not a multiple of `unit` (a block
    equal to the full array dim is always legal)."""
    if dim % unit != 0:
        return dim
    t = min(cap, dim)
    t -= t % unit
    while dim % t != 0:
        t -= unit
    return t


# ----------------------------------------------------------------------------
# Kernel 1: weighted average pooling (masked mean over the sequence axis)
# ----------------------------------------------------------------------------
def _wap_kernel(x_ref, m_ref, out_ref):
    # x_ref:   (1, TN, TH) bf16
    # m_ref:   (1, TN, 1)  f32   (already normalized: mask / (mask_sum+1e-9))
    # out_ref: (1, 1, TH)  f32   -- resident accumulator across the N axis
    @pl.when(pl.program_id(2) == 0)
    def _():
        out_ref[...] = jnp.zeros_like(out_ref)

    x = x_ref[...].astype(jnp.float32)                       # (1, TN, TH)
    m = m_ref[...]                                           # (1, TN, 1)
    out_ref[...] += jnp.sum(x * m, axis=1, keepdims=True)    # (1, 1, TH)


def weighted_average_pooling(x, masks, *, tile_n=512, tile_h=4096):
    """x: (B, N, H) bf16; masks: (B, N) int/float.  Returns (B, H) f32."""
    B, N, H = x.shape
    m = masks.astype(jnp.float32)
    # tiny (B, N) precompute -> exact torch semantics, no divide in the kernel
    m_norm = (m / (jnp.sum(m, axis=1, keepdims=True) + 1e-9)).reshape(B, N, 1)

    tn = _pick_tile(N, 8, tile_n)        # sublane-friendly N tile
    th = _pick_tile(H, 128, tile_h)      # lane-friendly H tile
    # keep the streamed block under ~4 MiB so double-buffering fits VMEM
    while (tn > 8 and tn % 2 == 0 and N % (tn // 2) == 0
           and tn * th * x.dtype.itemsize > 4 * 1024 * 1024):
        tn //= 2
    grid = (B, H // th, N // tn)

    flops = 2 * B * N * H
    bytes_accessed = int(B * N * H * x.dtype.itemsize + B * N * 4 + B * H * 4)

    out3 = pl.pallas_call(
        _wap_kernel,
        out_shape=jax.ShapeDtypeStruct((B, 1, H), jnp.float32),
        grid=grid,
        in_specs=[
            pl.BlockSpec((1, tn, th), lambda b, h, n: (b, n, h)),
            pl.BlockSpec((1, tn, 1), lambda b, h, n: (b, n, 0)),
        ],
        out_specs=pl.BlockSpec((1, 1, th), lambda b, h, n: (b, 0, h)),
        compiler_params=pltpu.CompilerParams(
            dimension_semantics=("parallel", "parallel", "arbitrary"),
            vmem_limit_bytes=32 * 1024 * 1024),
        cost_estimate=pl.CostEstimate(flops=flops, transcendentals=0,
                                      bytes_accessed=bytes_accessed),
    )(x, m_norm)
    return out3.reshape(B, H)


# ----------------------------------------------------------------------------
# Kernel 2: fused span-gather + trigger add + fc Linear (+ optional aug fc)
# ----------------------------------------------------------------------------
def _trig_fc_kernel(aug_scale, tm, *refs):
    # scalar-prefetch refs first, then inputs, then outputs, then scratch.
    if aug_scale is None:
        (idx_a_ref, idx_b_ref, hid_ref, w_ref, bias_ref,
         trig_ref, out_ref, a_buf, b_buf, sem) = refs
        noise_ref = feat_aug_ref = out_aug_ref = None
    else:
        (idx_a_ref, idx_b_ref, hid_ref, w_ref, bias_ref, noise_ref,
         trig_ref, out_ref, feat_aug_ref, out_aug_ref,
         a_buf, b_buf, sem) = refs

    t = pl.program_id(0)
    base = t * tm

    # Issue all 2*tm row-gather DMAs (HBM -> VMEM) before waiting on any of
    # them so the individual small-row latencies overlap.
    @pl.loop(0, tm)
    def _issue(s):
        ra = idx_a_ref[base + s]
        rb = idx_b_ref[base + s]
        pltpu.make_async_copy(hid_ref.at[pl.ds(ra, 1)],
                              a_buf.at[pl.ds(s, 1)], sem.at[0, s]).start()
        pltpu.make_async_copy(hid_ref.at[pl.ds(rb, 1)],
                              b_buf.at[pl.ds(s, 1)], sem.at[1, s]).start()

    @pl.loop(0, tm)
    def _wait(s):
        pltpu.make_async_copy(hid_ref.at[pl.ds(0, 1)],
                              a_buf.at[pl.ds(s, 1)], sem.at[0, s]).wait()
        pltpu.make_async_copy(hid_ref.at[pl.ds(0, 1)],
                              b_buf.at[pl.ds(s, 1)], sem.at[1, s]).wait()

    trig = a_buf[...] + b_buf[...]                  # (tm, H) bf16 add (torch parity)
    trig_ref[...] = trig

    w = w_ref[...]                                  # (H, C_pad) bf16, resident
    bias = bias_ref[...].astype(jnp.float32)        # (1, C_pad)

    out = jnp.dot(trig, w, preferred_element_type=jnp.float32) + bias
    out_ref[...] = out.astype(out_ref.dtype)

    if aug_scale is not None:
        noise = noise_ref[...].astype(jnp.float32)  # (tm, H)
        feat_aug = (trig.astype(jnp.float32) + noise * aug_scale
                    ).astype(jnp.bfloat16)
        feat_aug_ref[...] = feat_aug
        out_aug = jnp.dot(feat_aug, w, preferred_element_type=jnp.float32) + bias
        out_aug_ref[...] = out_aug.astype(out_aug_ref.dtype)


def trig_and_fc(hidden, span, w, bias, *, aug=None, noise_key=None,
                row_tile=32):
    """hidden: (B, N, H) bf16; span: (B, S, 2) int32; w: (H, C) bf16;
    bias: (1, C) or (C,) bf16.  Returns (trig_feat, outputs[, feature_aug,
    outputs_aug])."""
    B, N, H = hidden.shape
    S = span.shape[1]
    T = B * S
    C = w.shape[1]
    C_pad = pl.cdiv(C, 128) * 128             # lane-dense output / weight
    tm = min(row_tile, pl.cdiv(T, 8) * 8)     # rows per grid step (mult of 8)
    tm = max(8, tm - (tm % 8))
    T_pad = pl.cdiv(T, tm) * tm

    # flattened context rows, raw HBM ref inside the kernel (manual DMA gather)
    hidden2 = hidden.reshape(B * N, H)

    # global row indices of span starts / ends (scalar-prefetch gather table)
    row_base = (jnp.arange(B, dtype=jnp.int32) * N)[:, None]
    idx_a = (row_base + span[:, :, 0].astype(jnp.int32)).reshape(-1)
    idx_b = (row_base + span[:, :, 1].astype(jnp.int32)).reshape(-1)
    pad = T_pad - T
    if pad:
        zpad = jnp.zeros((pad,), jnp.int32)
        idx_a = jnp.concatenate([idx_a, zpad])
        idx_b = jnp.concatenate([idx_b, zpad])

    # zero-pad weight / bias so the output lane dim is a full 128 lanes
    w_pad = jnp.zeros((H, C_pad), w.dtype).at[:, :C].set(w)
    b_pad = jnp.zeros((1, C_pad), bias.dtype).at[:, :C].set(bias.reshape(1, C))

    hid_spec = pl.BlockSpec(memory_space=pl.ANY)                     # HBM ref
    w_spec = pl.BlockSpec((H, C_pad), lambda t, ia, ib: (0, 0))      # resident
    bias_spec = pl.BlockSpec((1, C_pad), lambda t, ia, ib: (0, 0))
    row_spec = pl.BlockSpec((tm, H), lambda t, ia, ib: (t, 0))
    fc_spec = pl.BlockSpec((tm, C_pad), lambda t, ia, ib: (t, 0))

    in_specs = [hid_spec, w_spec, bias_spec]
    operands = [idx_a, idx_b, hidden2, w_pad, b_pad]
    out_shapes = [jax.ShapeDtypeStruct((T_pad, H), jnp.bfloat16),
                  jax.ShapeDtypeStruct((T_pad, C_pad), jnp.bfloat16)]
    out_specs = [row_spec, fc_spec]

    if aug is not None:
        if noise_key is None:
            noise_key = jax.random.PRNGKey(0)
        # f32 draw then cast (torch randn_like-on-bf16 parity)
        noise = jax.random.normal(noise_key, (T_pad, H), dtype=jnp.float32
                                  ).astype(jnp.bfloat16)
        in_specs.append(row_spec)
        operands.append(noise)
        out_shapes += [jax.ShapeDtypeStruct((T_pad, H), jnp.bfloat16),
                       jax.ShapeDtypeStruct((T_pad, C_pad), jnp.bfloat16)]
        out_specs += [row_spec, fc_spec]

    results = pl.pallas_call(
        functools.partial(_trig_fc_kernel, aug, tm),
        out_shape=tuple(out_shapes),
        grid_spec=pltpu.PrefetchScalarGridSpec(
            num_scalar_prefetch=2,
            grid=(T_pad // tm,),
            in_specs=in_specs,
            out_specs=tuple(out_specs),
            scratch_shapes=[pltpu.VMEM((tm, H), jnp.bfloat16),   # a rows
                            pltpu.VMEM((tm, H), jnp.bfloat16),   # b rows
                            pltpu.SemaphoreType.DMA((2, tm))]),
        compiler_params=pltpu.CompilerParams(
            dimension_semantics=("arbitrary",),
            vmem_limit_bytes=32 * 1024 * 1024),
    )(*operands)

    trig_feat = results[0][:T]
    outputs = results[1][:T, :C]
    if aug is not None:
        feature_aug = results[2][:T]
        outputs_aug = results[3][:T, :C]
        return trig_feat, outputs, feature_aug, outputs_aug
    return trig_feat, outputs, None, None


# ----------------------------------------------------------------------------
# LLM2VecED.forward (post-backbone part)
# ----------------------------------------------------------------------------
def llm2vec_ed_forward(hidden, masks, fc_w, fc_b, span=None, aug=None,
                       noise_key=None):
    """hidden: (B, N, H) bf16 last_hidden_state stand-in for backbone_output[0].
    masks: (B, N); fc_w: (H, C) bf16; fc_b: (1, C) bf16; span: (B, S, 2) int32.
    """
    # TODO(synk): the LLM2Vec (Llama-3-8B + LoRA/PEFT) backbone itself is not
    # translatable to Pallas; `hidden` stands in for its last_hidden_state.
    B, N, H = hidden.shape
    return_dict = {}

    return_dict["reps"] = weighted_average_pooling(hidden, masks)
    return_dict["context_feat"] = hidden.reshape(-1, H)

    trig_feat, outputs, feature_aug, outputs_aug = trig_and_fc(
        hidden, span, fc_w, fc_b, aug=aug, noise_key=noise_key)
    return_dict["trig_feat"] = trig_feat
    return_dict["outputs"] = outputs
    if aug is not None:
        return_dict["feature_aug"] = feature_aug
        return_dict["outputs_aug"] = outputs_aug
    return return_dict


if __name__ == "__main__":
    # Small shapes: batch=2, seq=8, hidden=32, class_num=5, spans per item=3
    B, N, H, C, S = 2, 8, 32, 5, 3

    key = jax.random.PRNGKey(0)
    k_hidden, k_w, k_b, k_span, k_noise = jax.random.split(key, 5)

    hidden = jax.random.normal(k_hidden, (B, N, H), dtype=jnp.float32)
    hidden = hidden.astype(jnp.bfloat16)                 # backbone output dtype
    masks = jnp.array([[1, 1, 1, 1, 1, 0, 0, 0],
                       [1, 1, 1, 1, 1, 1, 1, 0]], dtype=jnp.int32)

    fc_w = (jax.random.normal(k_w, (H, C), dtype=jnp.float32) * 0.05
            ).astype(jnp.bfloat16)
    fc_b = (jax.random.normal(k_b, (1, C), dtype=jnp.float32) * 0.05
            ).astype(jnp.bfloat16)

    span = jax.random.randint(k_span, (B, S, 2), 0, N, dtype=jnp.int32)

    out = llm2vec_ed_forward(hidden, masks, fc_w, fc_b, span=span,
                             aug=0.1, noise_key=k_noise)
    jax.block_until_ready(out)

    # shape sanity checks
    assert out["reps"].shape == (B, H)
    assert out["context_feat"].shape == (B * N, H)
    assert out["trig_feat"].shape == (B * S, H)
    assert out["outputs"].shape == (B * S, C)
    assert out["feature_aug"].shape == (B * S, H)
    assert out["outputs_aug"].shape == (B * S, C)

    # numeric checks against a pure-JAX reference
    m = masks.astype(jnp.float32)
    m_norm = m / (jnp.sum(m, axis=1, keepdims=True) + 1e-9)
    reps_ref = jnp.sum(hidden.astype(jnp.float32) * m_norm[:, :, None], axis=1)
    assert jnp.allclose(out["reps"], reps_ref, atol=1e-3, rtol=1e-3)

    a_ref = jnp.concatenate([hidden[i][span[i, :, 0]] for i in range(B)])
    b_ref = jnp.concatenate([hidden[i][span[i, :, 1]] for i in range(B)])
    trig_ref = a_ref + b_ref                                     # bf16 add
    out_ref = (jnp.dot(trig_ref.astype(jnp.float32), fc_w.astype(jnp.float32))
               + fc_b.astype(jnp.float32))
    assert jnp.allclose(out["trig_feat"].astype(jnp.float32),
                        trig_ref.astype(jnp.float32), atol=2e-2, rtol=2e-2)
    assert jnp.allclose(out["outputs"].astype(jnp.float32), out_ref,
                        atol=5e-2, rtol=5e-2)
    assert bool(jnp.all(jnp.isfinite(out["outputs_aug"].astype(jnp.float32))))

    print("KERNEL_OK")
</pallas_src>

<mosaic_0001>
module attributes {stable_mosaic.version = 11 : i64} {
  func.func @_wap_kernel(%arg0: i32, %arg1: i32, %arg2: i32, %arg3: memref<1x8x32xbf16, #tpu.memory_space<vmem>>, %arg4: memref<1x8x1xf32, #tpu.memory_space<vmem>>, %arg5: memref<1x1x32xf32, #tpu.memory_space<vmem>>) attributes {dimension_semantics = [#tpu.dimension_semantics<parallel>, #tpu.dimension_semantics<parallel>, #tpu.dimension_semantics<arbitrary>], iteration_bounds = array<i64: 2, 1, 1>, scalar_prefetch = 0 : i64, scratch_operands = 0 : i64, tpu.core_type = #tpu.core_type<tc>, window_params = [{transform_indices = @transform_0, window_bounds = array<i64: 1, 8, 32>}, {transform_indices = @transform_1, window_bounds = array<i64: 1, 8, 1>}, {transform_indices = @transform_2, window_bounds = array<i64: 1, 1, 32>}]} {
    %c0_i32 = arith.constant 0 : i32
    %0 = arith.cmpi eq, %arg2, %c0_i32 : i32
    %1 = arith.extui %0 : i1 to i32
    %c0_i32_0 = arith.constant 0 : i32
    %2 = arith.cmpi ne, %1, %c0_i32_0 : i32
    scf.if %2 {
      %cst_12 = arith.constant 0.000000e+00 : f32
      %13 = vector.broadcast %cst_12 : f32 to vector<1x1x32xf32>
      %c0_13 = arith.constant 0 : index
      %c0_14 = arith.constant 0 : index
      %c0_15 = arith.constant 0 : index
      %14 = vector.load %arg5[%c0_13, %c0_14, %c0_15] : memref<1x1x32xf32, #tpu.memory_space<vmem>>, vector<1x1x32xf32>
      tpu.vector_store %arg5[%c0_13, %c0_14, %c0_15], %13 {strides = array<i32>} : memref<1x1x32xf32, #tpu.memory_space<vmem>>, vector<1x1x32xf32>,
    } else {
    }
    %c0 = arith.constant 0 : index
    %c0_1 = arith.constant 0 : index
    %c0_2 = arith.constant 0 : index
    %3 = vector.load %arg3[%c0, %c0_1, %c0_2] : memref<1x8x32xbf16, #tpu.memory_space<vmem>>, vector<1x8x32xbf16>
    %4 = arith.extf %3 : vector<1x8x32xbf16> to vector<1x8x32xf32>
    %c0_3 = arith.constant 0 : index
    %c0_4 = arith.constant 0 : index
    %c0_5 = arith.constant 0 : index
    %5 = vector.load %arg4[%c0_3, %c0_4, %c0_5] : memref<1x8x1xf32, #tpu.memory_space<vmem>>, vector<1x8x1xf32>
    %c0_6 = arith.constant 0 : index
    %c0_7 = arith.constant 0 : index
    %c0_8 = arith.constant 0 : index
    %6 = vector.load %arg5[%c0_6, %c0_7, %c0_8] : memref<1x1x32xf32, #tpu.memory_space<vmem>>, vector<1x1x32xf32>
    %7 = vector.broadcast %5 : vector<1x8x1xf32> to vector<1x8x32xf32>
    %8 = arith.mulf %4, %7 : vector<1x8x32xf32>
    %cst = arith.constant dense<0.000000e+00> : vector<1x32xf32>
    %9 = vector.multi_reduction <add>, %8, %cst [1] : vector<1x8x32xf32> to vector<1x32xf32>
    %10 = vector.shape_cast %9 : vector<1x32xf32> to vector<1x1x32xf32>
    %11 = arith.addf %6, %10 : vector<1x1x32xf32>
    %c0_9 = arith.constant 0 : index
    %c0_10 = arith.constant 0 : index
    %c0_11 = arith.constant 0 : index
    %12 = vector.load %arg5[%c0_9, %c0_10, %c0_11] : memref<1x1x32xf32, #tpu.memory_space<vmem>>, vector<1x1x32xf32>
    tpu.vector_store %arg5[%c0_9, %c0_10, %c0_11], %11 {strides = array<i32>} : memref<1x1x32xf32, #tpu.memory_space<vmem>>, vector<1x1x32xf32>,
    return
  }
  func.func @transform_0(%arg0: i32, %arg1: i32, %arg2: i32) -> (i32, i32, i32) {
    %c0_i32 = arith.constant 0 : i32
    return %arg0, %arg2, %arg1 : i32, i32, i32
  }
  func.func @transform_1(%arg0: i32, %arg1: i32, %arg2: i32) -> (i32, i32, i32) {
    %c0_i32 = arith.constant 0 : i32
    %c0_i32_0 = arith.constant 0 : i32
    return %arg0, %arg2, %c0_i32 : i32, i32, i32
  }
  func.func @transform_2(%arg0: i32, %arg1: i32, %arg2: i32) -> (i32, i32, i32) {
    %c0_i32 = arith.constant 0 : i32
    %c0_i32_0 = arith.constant 0 : i32
    return %arg0, %c0_i32, %arg1 : i32, i32, i32
  }
}

</mosaic_0001>

<bundles_post_ra>
// kernel: tpu_custom_call.1
= control target key start
LH: loop header
LB: loop body
LE: loop exit
PB: predicated region body
PF: predicated region fallthrough
CT: control target
= control target key end

     0   :  { %7 = vsyncpa [#allocation3], 0  ;;  %s621_s0 = inlined_call_operand.vmem [shape: bf16[2,8,32], index: 0, kind: input, shape index: {}]   ;;  %s622_s1 = inlined_call_operand.vmem [shape: f32[2,8,1], index: 1, kind: input, shape index: {}]   ;;  %s623_s2 = inlined_call_operand.hbm [shape: f32[2,1,32], index: 2, kind: output, shape index: {}]  }
   0x1   :  { %9 = vsyncpa [#allocation3 + $0x1], 0  ;;  %s504_s9 = smov 0   ;;  %s506_s10 = smov 0  }
   0x2   :  { %s508_s11 = smov 0   ;;  %s510_s12 = smov 0  }
   0x3   :  { %s512_s13 = smov 0   ;;  %s514_s14 = smov 0  }
   0x4 LB: > { %s338_s15 = sadd.s32 4294967295, %s484_s14   ;;  %s339_s16 = sadd.s32 4294967294, %s484_s14   ;;  %s484_s14 = sphi %s514_s14, %s15_s14   ;;  %s480_s13 = sphi %s512_s13, %s630_s13   ;;  %s476_s12 = sphi %s510_s12, %s629_s12   ;;  %s472_s11 = sphi %s508_s11, %s628_s11   ;;  %s468_s10 = sphi %s506_s10, %s627_s10   ;;  %s464_s9 = sphi %s504_s9, %s626_s9  }
   0x5   : > { %s34_s17 = sadd.s32 1, %s480_s13  ;;  %s101_s18 = sadd.s32 1, %s472_s11 }
   0x6   : > { %p36_p0 = scmp.ge.s32.totalorder %s34_s17, 2  ;;  %p111_p1 = scmp.ne.s32.totalorder %s472_s11, %s468_s10 }
   0x7   : > { %p112_p2 = scmp.eq.s32.totalorder %s338_s15, 1  ;;  %p117_p3 = scmp.ne.s32.totalorder %s468_s10, %s464_s9 }
   0x8   : > { %s632_s17 = smov (%p36_p0, %s34_s17), 0  ;;  %p118_p5 = scmp.eq.s32.totalorder %s339_s16, 1 }
   0x9   : > { %p544_p4 = por %p112_p2, %p111_p1  ;;  %s96_s20 = ssub.s32 %s480_s13, %s632_s17 }
   0xa   : > { %p342_p6 = scmp.ge.s32.totalorder %s484_s14, 1  ;;  %p99_p7 = scmp.eq.s32.totalorder %s96_s20, 0 }
   0xb   : > { %p551_p8 = por %p118_p5, %p117_p3  ;;  %p159_p9 = scmp.lt.s32.totalorder %s484_s14, 3 }
   0xc   : > { %s557_s22 = scalar_select %p99_p7, %s472_s11, %s101_s18  }
   0xd   : > { %p160_p10 = pnand %p342_p6, %p159_p9 }
   0xe   : > { %p192_p11 = scmp.lt.s32.totalorder (!%p160_p10), %s476_s12, 1  ;;  %v486_v0 = vmov (!%p160_p10), 0   ;;  %s190_s28 = sand.u32 (!%p160_p10), 1, %s468_s10   ;;  %vm213_vm0 = vcmask (!%p160_p10), 253952   ;;  %v487_v2 = vmov (!%p160_p10), 0.0   ;;  %vm225_vm1 = vcmask (!%p160_p10), 261120  }
   0xf   : > { %163 = sbr.rel (%p160_p10) target bundleno = 186 (0xba), region = 28  ;;  %405 = vset.pattern.permute.xlu0 (!%p160_p10), %v486_v0  ;;  %s191_s29 = scalar_lea.vmem (!%p160_p10), [#allocation2], %s190_s28 }
  0x10   : > { %214 = vst.msk [vmem:[%s191_s29] sm:$0x1] (!%p160_p10), %vm213_vm0, %v487_v2  ;;  %s345_s6 = sshll.u32 (!%p160_p10), %s476_s12, 4  ;;  %s250_s7 = sshll.u32 (!%p160_p10), %s191_s29, 4  ;;  %s575_s7 = int_to_ptr.vmem [resolvable:$true] %s250_s7 }
  0x11   : > { %s573_s16 = scalar_lea.hbm (!%p160_p10), %s623_s2, %s345_s6  ;;  %s237_s18 = scalar_lea.sflag (!%p160_p10), [#allocation3], %s190_s28 }
  0x12   : > { %s406_s20 = scalar_lea.vmem (!%p160_p10), %s575_s7, 16 }
  0x13   : > { %p407_p12 = scmp.ne.s32.totalorder (!%p160_p10), %s575_s7, %s406_s20 }
  0x15   : > { %p408_p13 = pnand (!%p160_p10), %p407_p12, %p544_p4 }
  0x16   : > { %s193_s23 = scalar_select %p192_p11, %s476_s12, 1 }
  0x17   : > { %v218_v13 = vld [vmem:[%s191_s29] sm:$0x1]  ;;  %p409_p0 = pneg %p408_p13  ;;  %s488_s12 = smov [#allocation2]  }
  0x18   : > { %s344_s24 = sshll.u32 %s193_s23, 3  ;;  %s343_s30 = sshll.u32 %s193_s23, 2 }
  0x19   : > { %s208_s27 = scalar_lea.vmem %s622_s1, %s344_s24  ;;  %s201_s5 = scalar_lea.vmem %s621_s0, %s343_s30 }
  0x1a   : > { %v217_v1 = vld [vmem:[%s208_s27] sm:$0xff]  ;;  %s410_s23 = sshll.u32 %s488_s12, 4  ;;  %s411_s23 = int_to_ptr.vmem [resolvable:$false] %s410_s23 }
  0x1b   : > { %221 = vperm.xlu0 %405, %v217_v1   ;;  %v215_v3 = vld [vmem:[%s201_s5] sm:$0xf]  ;;  %s412_s24 = scalar_lea.vmem %s411_s23, 32  ;;  %p413_p1 = scmp.lt.s32.totalorder %s575_s7, %s411_s23 }
  0x1c   : > { %v216_v4 = vunpack.c.l.bf16 %v215_v3  ;;  %p414_p2 = scmp.lt.s32.totalorder %s412_s24, %s406_s20 }
  0x1e   : > { %p415_p3 = por %p414_p2, %p413_p1 }
  0x20   : > { %p416_p5 = pnand %p415_p3, %p409_p0 }
  0x9a   : > { %v222_v5 = vpop.permute.xlu0 %221 }
  0x9b   : > { %v224_v6 = vmul.f32 %v222_v5, %v216_v4 }
  0x9d   : > { %v226_v7 = vsel %vm225_vm1, %v224_v6, 0.0 }
  0x9e   : > { %v227_v8 = vrot.slane %v226_v7, 4 }
  0xa0   : > { %v228_v9 = vadd.f32 %v227_v8, %v226_v7 }
  0xa2   : > { %v229_v10 = vrot.slane %v228_v9, 2 }
  0xa4   : > { %v230_v11 = vadd.f32 %v229_v10, %v228_v9 }
  0xa6   : > { %v231_v12 = vrot.slane %v230_v11, 1 }
  0xa8   : > { %v232_v14 = vadd.f32 %v231_v12, %v230_v11 }
  0xaa   : > { %v233_v15 = vadd.f32 %v232_v14, %v218_v13 }
  0xac   : > { %235 = vst.msk [vmem:[%s191_s29] sm:$0x1] %vm213_vm0, %v233_v15 }
  0xad   : > { %419 = shalt.err (!%p416_p5)
}
  0xae   : > { %s420_s25 = scalar_lea.hbm %s573_s16, 16  ;;  %s424_s28 = scalar_lea.hbm %s623_s2, 32 }
  0xaf   : > { %p421_p6 = scmp.ne.s32.totalorder %s573_s16, %s420_s25  ;;  %p425_p10 = scmp.lt.u32.totalorder %s573_s16, %s623_s2 }
  0xb0   : > { %p426_p11 = scmp.lt.u32.totalorder %s424_s28, %s420_s25  ;;  %p428_p13 = scmp.lt.u32.totalorder %s420_s25, %s573_s16 }
  0xb1   : > { %p422_p7 = pnand %p421_p6, %p544_p4 }
  0xb2   : > { %p427_p12 = por %p426_p11, %p425_p10 }
  0xb3   : > { %p423_p9 = pneg %p422_p7 }
  0xb4   : > { %p429_p0 = por %p428_p13, %p427_p12 }
  0xb6   : > { %p430_p1 = pnand %p429_p0, %p423_p9 }
  0xb8   : > { %433 = shalt.err (!%p430_p1)
}
  0xb9   : > { %348 = dma.vmem_to_hbm [thread:$0]  (%p544_p4), %s575_s7, 16, %s573_s16, %s237_s18  }
  0xba PF: > { %p354_p2 = scmp.ge.s32.totalorder %s484_s14, 2  ;;  %s262_s3 = sand.u32 1, %s464_s9  }
  0xbb   : > { %s263_s4 = scalar_lea.sflag [#allocation3], %s262_s3 }
  0xbc   : > { %p351_p3 = pnand %p354_p2, %p551_p8 }
  0xbe   : > { %459 = dma.done.wait (!%p351_p3), %s263_s4, 16  }
  0xbf   : > { %461 = vsyncadd (!%p351_p3), %s263_s4, 4294967280  ;;  %s15_s14 = sadd.s32 1, %s484_s14   ;;  %s626_s9 = smov %s468_s10 }
  0xc0   : > { %p12_p5 = scmp.ge.s32.totalorder %s15_s14, 4   ;;  %s627_s10 = smov %s472_s11 }
  0xc1   : > { %s628_s11 = smov %s557_s22  ;;  %s629_s12 = smov %s480_s13 }
  0xc2   : > { %s630_s13 = smov %s632_s17  ;;  %14 = sbr.rel (!%p12_p5) target bundleno = 4 (0x4), region = 70 }
  0xc9   :  { %267 = vsyncpa [#allocation3], 1 }
  0xca   :  { %269 = vsyncpa [#allocation3 + $0x1], 1 }

</bundles_post_ra>
